<compile_context>
chip_gen: v5e
topology: v5e:2x2
jax: 0.10.0
libtpu: 0.0.40
codegen_flags: <defaults>
</compile_context>

<pallas_src>
import numpy as np
import jax
import jax.numpy as jnp
from jax.experimental import pallas as pl
from jax.experimental.pallas import tpu as pltpu


# -----------------------------------------------------------------------------
# Fused multi-timestep TH-LSTM kernel (grid axis = time, sequential)
# -----------------------------------------------------------------------------
def th_lstm_kernel(
    # inputs (all constant index maps except none -- everything VMEM-resident)
    x_ref,        # (T*B, Din)    full input sequence, flattened over time
    dt_ref,       # (B, 1)        delta_t (fixed in the module)
    hc0_ref,      # (2, B, H)     initial hidden (row 0) and cell (row 1) state
    gam_ref,      # (2, H)        row 0: W_gamma row, row 1: b_gamma_lin + b_gamma
    wg_ref,       # (Din+H, 4H)   stacked [W_ih^T ; W_hh^T], gate order i,f,g,o
    bg_ref,       # (1, 4H)       b_ih + b_hh (pre-folded)
    wfc_ref,      # (2H, Dout)    stacked [W_fc_h^T ; W_fc_c^T]
    bfc_ref,      # (1, Dout)
    # outputs
    out_ref,      # (T, B, Dout)  per-step fc output, VMEM-resident, one writeback
    h_ref,        # (B, H)        VMEM-resident running hidden state / final h
    c_ref,        # (B, H)        VMEM-resident running cell state / final c
    # scratch
    gamma_s,      # (B, H)        cached time-gate factor (constant over steps)
    xproj_s,      # (T*B, 4H)     cached input projection for all steps
):
    f32 = jnp.float32
    t = pl.program_id(0)
    B, H = h_ref.shape
    Din = x_ref.shape[-1]

    # ---- one-time work: seed state, cache gamma, precompute input projection ---
    @pl.when(t == 0)
    def _():
        h_ref[...] = hc0_ref[0]
        c_ref[...] = hc0_ref[1]
        # TimeAwareGate: gamma = exp(-relu(W_gamma(dt) + b_gamma)); dt is fixed,
        # so gamma is constant across the whole sequence -> compute once.
        pre = dt_ref[...] * gam_ref[0:1, :] + gam_ref[1:2, :]      # (B, H)
        gamma_s[...] = jnp.exp(-jnp.maximum(pre, 0.0))
        # Input projection for ALL timesteps in one MXU matmul (time-parallel,
        # hoisted out of the sequential recurrence). Bias folded in here.
        xproj_s[...] = (
            jnp.dot(x_ref[...], wg_ref[:Din, :], preferred_element_type=f32)
            + bg_ref[...]
        )

    h_prev = h_ref[...]
    c_prev = c_ref[...]
    h_cand = gamma_s[...] * h_prev                                  # (B, H)

    # ---- nn.LSTMCell (PyTorch gate order i, f, g, o) ---------------------------
    row0 = pl.multiple_of(t * B, B)
    gates = (
        xproj_s[pl.ds(row0, B), :]
        + jnp.dot(h_cand, wg_ref[Din:, :], preferred_element_type=f32)
    )                                                               # (B, 4H)
    # Full-width sigmoid/tanh + lane-mask select (EUP passes over one vreg).
    lane = jax.lax.broadcasted_iota(jnp.int32, gates.shape, 1)
    is_g_lane = (lane >= 2 * H) & (lane < 3 * H)
    act = jnp.where(is_g_lane, jnp.tanh(gates), jax.nn.sigmoid(gates))
    i_g = act[:, 0 * H:1 * H]
    f_g = act[:, 1 * H:2 * H]
    g_g = act[:, 2 * H:3 * H]
    o_g = act[:, 3 * H:4 * H]

    c_new = f_g * c_prev + i_g * g_g
    h_new = o_g * jnp.tanh(c_new)
    # TODO(synk): nn.Dropout(p=0.8) implemented as identity (inference semantics).

    # ---- HistoricalAttention on a single history entry -------------------------
    # softmax over a size-1 axis is identically 1.0 => context == c_new exactly;
    # the score path (W_h, W_c, v) is mathematically dead and is elided.
    context = c_new

    # ---- fc on concat([h, context]) as a split matmul over one stacked weight --
    out = (
        jnp.dot(h_new, wfc_ref[:H, :], preferred_element_type=f32)
        + jnp.dot(context, wfc_ref[H:, :], preferred_element_type=f32)
        + bfc_ref[...]
    )

    out_ref[t] = out                 # resident output, single HBM writeback at end
    h_ref[...] = h_new               # state carried in VMEM across steps
    c_ref[...] = c_new


# -----------------------------------------------------------------------------
# Wrapper: parameter folding + pallas_call.
# One call == T sequential invocations of TH_LSTM.forward with persistent state.
# -----------------------------------------------------------------------------
def th_lstm_forward_fused(x_seq, h0, c0, delta_t, p):
    T, B, Din = x_seq.shape
    H = h0.shape[-1]
    Dout = p["w_fc"].shape[0]
    f32 = jnp.float32

    def row(v):
        return v.reshape(1, -1).astype(f32)

    hc0 = jnp.stack([h0.astype(f32), c0.astype(f32)], axis=0)                    # (2, B, H)
    gam = jnp.stack(
        [p["w_gamma"].reshape(-1), p["b_gamma_lin"] + p["b_gamma"]], axis=0
    ).astype(f32)                                                                # (2, H)
    w_gates = jnp.concatenate([p["w_ih"].T, p["w_hh"].T], axis=0).astype(f32)    # (Din+H, 4H)
    b_gates = row(p["b_ih"] + p["b_hh"])                                         # (1, 4H)
    w_fc = p["w_fc"].T.astype(f32)                                               # (2H, Dout)
    b_fc = row(p["b_fc"])                                                        # (1, Dout)

    inputs = (
        x_seq.reshape(T * B, Din).astype(f32),   # flattened over time (free XLA reshape)
        delta_t.astype(f32), hc0, gam, w_gates, b_gates, w_fc, b_fc,
    )

    def const_spec(shape):
        n = len(shape)
        return pl.BlockSpec(shape, lambda t, _n=n: (0,) * _n)

    in_specs = [
        const_spec((T * B, Din)),                # full input sequence (resident)
        const_spec((B, 1)),                      # delta_t
        const_spec((2, B, H)),                   # initial h/c
        const_spec((2, H)),                      # time-gate params
        const_spec((Din + H, 4 * H)),            # stacked gate weights
        const_spec((1, 4 * H)),                  # folded gate bias
        const_spec((2 * H, Dout)),               # fc weight
        const_spec((1, Dout)),                   # fc bias
    ]
    out_specs = (
        pl.BlockSpec((T, B, Dout), lambda t: (0, 0, 0)),  # per-step outputs (resident)
        pl.BlockSpec((B, H), lambda t: (0, 0)),           # final h (resident)
        pl.BlockSpec((B, H), lambda t: (0, 0)),           # final c (resident)
    )
    out_shapes = (
        jax.ShapeDtypeStruct((T, B, Dout), f32),
        jax.ShapeDtypeStruct((B, H), f32),
        jax.ShapeDtypeStruct((B, H), f32),
    )

    fn = pl.pallas_call(
        th_lstm_kernel,
        grid=(T,),
        in_specs=in_specs,
        out_specs=out_specs,
        out_shape=out_shapes,
        scratch_shapes=[
            pltpu.VMEM((B, H), f32),             # cached gamma
            pltpu.VMEM((T * B, 4 * H), f32),     # cached input projection
        ],
        # Time axis carries the recurrence -> must be sequential ("arbitrary").
        compiler_params=pltpu.CompilerParams(dimension_semantics=("arbitrary",)),
    )
    return fn(*inputs)


# -----------------------------------------------------------------------------
# Pure-JAX reference: exact mirror of the PyTorch single-step forward
# (including the attention score path, eval-mode dropout).
# -----------------------------------------------------------------------------
def th_lstm_reference_step(x, h_t, c_t, delta_t, p):
    H = h_t.shape[-1]
    pre = delta_t @ p["w_gamma"].T + p["b_gamma_lin"] + p["b_gamma"]
    gamma = jnp.exp(-jnp.maximum(pre, 0.0))
    h_cand = gamma * h_t
    gates = x @ p["w_ih"].T + p["b_ih"] + h_cand @ p["w_hh"].T + p["b_hh"]
    i = jax.nn.sigmoid(gates[:, :H])
    f = jax.nn.sigmoid(gates[:, H:2 * H])
    g = jnp.tanh(gates[:, 2 * H:3 * H])
    o = jax.nn.sigmoid(gates[:, 3 * H:])
    c_new = f * c_t + i * g
    h_new = o * jnp.tanh(c_new)
    a = jnp.tanh(h_new @ p["w_h"].T + p["b_h"] + c_new @ p["w_c"].T + p["b_c"])
    score = a @ p["v_w"].T + p["v_b"]                       # (B, 1)
    attn = jax.nn.softmax(score[:, None, :], axis=1)[:, 0, :]
    context = attn * c_new
    out = jnp.concatenate([h_new, context], axis=1) @ p["w_fc"].T + p["b_fc"]
    return out, h_new, c_new


def init_params(key, input_dim, hidden_dim, output_dim):
    ks = iter(jax.random.split(key, 20))

    def lin_w(k, out_f, in_f):
        bound = 1.0 / np.sqrt(in_f)
        return jax.random.uniform(k, (out_f, in_f), jnp.float32, -bound, bound)

    def lin_b(k, out_f, in_f):
        bound = 1.0 / np.sqrt(in_f)
        return jax.random.uniform(k, (out_f,), jnp.float32, -bound, bound)

    H = hidden_dim
    lstm_bound = 1.0 / np.sqrt(H)
    return {
        # LSTMCell
        "w_ih": jax.random.uniform(next(ks), (4 * H, input_dim), jnp.float32, -lstm_bound, lstm_bound),
        "w_hh": jax.random.uniform(next(ks), (4 * H, H), jnp.float32, -lstm_bound, lstm_bound),
        "b_ih": jax.random.uniform(next(ks), (4 * H,), jnp.float32, -lstm_bound, lstm_bound),
        "b_hh": jax.random.uniform(next(ks), (4 * H,), jnp.float32, -lstm_bound, lstm_bound),
        # TimeAwareGate
        "w_gamma": lin_w(next(ks), H, 1),
        "b_gamma_lin": lin_b(next(ks), H, 1),
        "b_gamma": jnp.zeros((H,), jnp.float32),
        # HistoricalAttention (kept for spec fidelity; output is independent of them)
        "w_h": lin_w(next(ks), H, H), "b_h": lin_b(next(ks), H, H),
        "w_c": lin_w(next(ks), H, H), "b_c": lin_b(next(ks), H, H),
        "v_w": lin_w(next(ks), 1, H), "v_b": lin_b(next(ks), 1, H),
        # fc
        "w_fc": lin_w(next(ks), output_dim, 2 * H),
        "b_fc": lin_b(next(ks), output_dim, 2 * H),
    }


if __name__ == "__main__":
    B, Din, H, Dout, T = 8, 16, 32, 4, 8

    key = jax.random.PRNGKey(0)
    pkey, xkey = jax.random.split(key)
    params = init_params(pkey, Din, H, Dout)

    # Persistent state as in TH_LSTM.__init__ (batch_size = B)
    h0 = jnp.zeros((B, H), jnp.float32)
    c0 = jnp.zeros((B, H), jnp.float32)
    delta_t = jnp.arange(1, B + 1, dtype=jnp.float32).reshape(B, 1)

    # T-step input sequence: one fused kernel call == T module.forward calls
    x_seq = jax.random.normal(xkey, (T, B, Din), jnp.float32)

    out_k, hT_k, cT_k = th_lstm_forward_fused(x_seq, h0, c0, delta_t, params)
    jax.block_until_ready((out_k, hT_k, cT_k))

    # Reference: unrolled step-by-step forward
    h_r, c_r = h0, c0
    outs_r = []
    for t in range(T):
        o_r, h_r, c_r = th_lstm_reference_step(x_seq[t], h_r, c_r, delta_t, params)
        outs_r.append(o_r)
    out_r = jnp.stack(outs_r, axis=0)

    ok = bool(np.allclose(out_k, out_r, atol=1e-4, rtol=1e-4))
    ok &= bool(np.allclose(hT_k, h_r, atol=1e-4, rtol=1e-4))
    ok &= bool(np.allclose(cT_k, c_r, atol=1e-4, rtol=1e-4))

    if ok:
        print("KERNEL_OK")
    else:
        print("MISMATCH")
</pallas_src>

<mosaic_0001>
module attributes {stable_mosaic.version = 11 : i64} {
  func.func @th_lstm_kernel(%arg0: i32, %arg1: memref<64x16xf32, #tpu.memory_space<vmem>>, %arg2: memref<8x1xf32, #tpu.memory_space<vmem>>, %arg3: memref<2x8x32xf32, #tpu.memory_space<vmem>>, %arg4: memref<2x32xf32, #tpu.memory_space<vmem>>, %arg5: memref<48x128xf32, #tpu.memory_space<vmem>>, %arg6: memref<1x128xf32, #tpu.memory_space<vmem>>, %arg7: memref<64x4xf32, #tpu.memory_space<vmem>>, %arg8: memref<1x4xf32, #tpu.memory_space<vmem>>, %arg9: memref<8x8x4xf32, #tpu.memory_space<vmem>>, %arg10: memref<8x32xf32, #tpu.memory_space<vmem>>, %arg11: memref<8x32xf32, #tpu.memory_space<vmem>>, %arg12: memref<8x32xf32, #tpu.memory_space<vmem>>, %arg13: memref<64x128xf32, #tpu.memory_space<vmem>>) attributes {dimension_semantics = [#tpu.dimension_semantics<arbitrary>], iteration_bounds = array<i64: 8>, scalar_prefetch = 0 : i64, scratch_operands = 2 : i64, tpu.core_type = #tpu.core_type<tc>, window_params = [{pipeline_mode = #tpu.pipeline_mode<synchronous>, transform_indices = @transform_0, window_bounds = array<i64: 64, 16>}, {pipeline_mode = #tpu.pipeline_mode<synchronous>, transform_indices = @transform_1, window_bounds = array<i64: 8, 1>}, {pipeline_mode = #tpu.pipeline_mode<synchronous>, transform_indices = @transform_2, window_bounds = array<i64: 2, 8, 32>}, {pipeline_mode = #tpu.pipeline_mode<synchronous>, transform_indices = @transform_3, window_bounds = array<i64: 2, 32>}, {pipeline_mode = #tpu.pipeline_mode<synchronous>, transform_indices = @transform_4, window_bounds = array<i64: 48, 128>}, {pipeline_mode = #tpu.pipeline_mode<synchronous>, transform_indices = @transform_5, window_bounds = array<i64: 1, 128>}, {pipeline_mode = #tpu.pipeline_mode<synchronous>, transform_indices = @transform_6, window_bounds = array<i64: 64, 4>}, {pipeline_mode = #tpu.pipeline_mode<synchronous>, transform_indices = @transform_7, window_bounds = array<i64: 1, 4>}, {pipeline_mode = #tpu.pipeline_mode<synchronous>, transform_indices = @transform_8, window_bounds = array<i64: 8, 8, 4>}, {pipeline_mode = #tpu.pipeline_mode<synchronous>, transform_indices = @transform_9, window_bounds = array<i64: 8, 32>}, {pipeline_mode = #tpu.pipeline_mode<synchronous>, transform_indices = @transform_10, window_bounds = array<i64: 8, 32>}]} {
    %c0_i32 = arith.constant 0 : i32
    %0 = arith.cmpi eq, %arg0, %c0_i32 : i32
    %1 = arith.extui %0 : i1 to i32
    %c0_i32_0 = arith.constant 0 : i32
    %2 = arith.cmpi ne, %1, %c0_i32_0 : i32
    scf.if %2 {
      %c0_22 = arith.constant 0 : index
      %c0_23 = arith.constant 0 : index
      %c0_24 = arith.constant 0 : index
      %50 = vector.load %arg3[%c0_22, %c0_23, %c0_24] : memref<2x8x32xf32, #tpu.memory_space<vmem>>, vector<1x8x32xf32>
      %51 = vector.shape_cast %50 : vector<1x8x32xf32> to vector<8x32xf32>
      %c0_25 = arith.constant 0 : index
      %c0_26 = arith.constant 0 : index
      %52 = vector.load %arg10[%c0_25, %c0_26] : memref<8x32xf32, #tpu.memory_space<vmem>>, vector<8x32xf32>
      tpu.vector_store %arg10[%c0_25, %c0_26], %51 {strides = array<i32>} : memref<8x32xf32, #tpu.memory_space<vmem>>, vector<8x32xf32>,
      %c1 = arith.constant 1 : index
      %c0_27 = arith.constant 0 : index
      %c0_28 = arith.constant 0 : index
      %53 = vector.load %arg3[%c1, %c0_27, %c0_28] : memref<2x8x32xf32, #tpu.memory_space<vmem>>, vector<1x8x32xf32>
      %54 = vector.shape_cast %53 : vector<1x8x32xf32> to vector<8x32xf32>
      %c0_29 = arith.constant 0 : index
      %c0_30 = arith.constant 0 : index
      %55 = vector.load %arg11[%c0_29, %c0_30] : memref<8x32xf32, #tpu.memory_space<vmem>>, vector<8x32xf32>
      tpu.vector_store %arg11[%c0_29, %c0_30], %54 {strides = array<i32>} : memref<8x32xf32, #tpu.memory_space<vmem>>, vector<8x32xf32>,
      %c0_31 = arith.constant 0 : index
      %c0_32 = arith.constant 0 : index
      %56 = vector.load %arg2[%c0_31, %c0_32] : memref<8x1xf32, #tpu.memory_space<vmem>>, vector<8x1xf32>
      %c0_33 = arith.constant 0 : index
      %c0_34 = arith.constant 0 : index
      %57 = vector.load %arg4[%c0_33, %c0_34] : memref<2x32xf32, #tpu.memory_space<vmem>>, vector<1x32xf32>
      %58 = vector.broadcast %56 : vector<8x1xf32> to vector<8x32xf32>
      %59 = vector.broadcast %57 : vector<1x32xf32> to vector<8x32xf32>
      %60 = arith.mulf %58, %59 : vector<8x32xf32>
      %c1_35 = arith.constant 1 : index
      %c0_36 = arith.constant 0 : index
      %61 = vector.load %arg4[%c1_35, %c0_36] : memref<2x32xf32, #tpu.memory_space<vmem>>, vector<1x32xf32>
      %62 = vector.broadcast %61 : vector<1x32xf32> to vector<8x32xf32>
      %63 = arith.addf %60, %62 : vector<8x32xf32>
      %cst_37 = arith.constant 0.000000e+00 : f32
      %64 = vector.broadcast %cst_37 : f32 to vector<8x32xf32>
      %65 = arith.maximumf %63, %64 : vector<8x32xf32>
      %cst_38 = arith.constant 0.000000e+00 : f32
      %66 = vector.broadcast %cst_38 : f32 to vector<8x32xf32>
      %67 = arith.subf %66, %65 : vector<8x32xf32>
      %68 = math.exp %67 : vector<8x32xf32>
      %c0_39 = arith.constant 0 : index
      %c0_40 = arith.constant 0 : index
      %69 = vector.load %arg12[%c0_39, %c0_40] : memref<8x32xf32, #tpu.memory_space<vmem>>, vector<8x32xf32>
      tpu.vector_store %arg12[%c0_39, %c0_40], %68 {strides = array<i32>} : memref<8x32xf32, #tpu.memory_space<vmem>>, vector<8x32xf32>,
      %c0_41 = arith.constant 0 : index
      %c0_42 = arith.constant 0 : index
      %70 = vector.load %arg1[%c0_41, %c0_42] : memref<64x16xf32, #tpu.memory_space<vmem>>, vector<64x16xf32>
      %c0_43 = arith.constant 0 : index
      %c0_44 = arith.constant 0 : index
      %71 = vector.load %arg5[%c0_43, %c0_44] : memref<48x128xf32, #tpu.memory_space<vmem>>, vector<16x128xf32>
      %cst_45 = arith.constant dense<0.000000e+00> : vector<64x128xf32>
      %72 = tpu.matmul %70, %71, %cst_45 {dimension_numbers = #tpu.dot_dimension_numbers<[1], [0], [0], [1], [0, 0, 1, 1], [], []>} : vector<64x16xf32>, vector<16x128xf32>, vector<64x128xf32> -> vector<64x128xf32>
      %c0_46 = arith.constant 0 : index
      %c0_47 = arith.constant 0 : index
      %73 = vector.load %arg6[%c0_46, %c0_47] : memref<1x128xf32, #tpu.memory_space<vmem>>, vector<1x128xf32>
      %74 = vector.broadcast %73 : vector<1x128xf32> to vector<64x128xf32>
      %75 = arith.addf %72, %74 : vector<64x128xf32>
      %c0_48 = arith.constant 0 : index
      %c0_49 = arith.constant 0 : index
      %76 = vector.load %arg13[%c0_48, %c0_49] : memref<64x128xf32, #tpu.memory_space<vmem>>, vector<64x128xf32>
      tpu.vector_store %arg13[%c0_48, %c0_49], %75 {strides = array<i32>} : memref<64x128xf32, #tpu.memory_space<vmem>>, vector<64x128xf32>,
    } else {
    }
    %c0 = arith.constant 0 : index
    %c0_1 = arith.constant 0 : index
    %3 = vector.load %arg10[%c0, %c0_1] : memref<8x32xf32, #tpu.memory_space<vmem>>, vector<8x32xf32>
    %c0_2 = arith.constant 0 : index
    %c0_3 = arith.constant 0 : index
    %4 = vector.load %arg11[%c0_2, %c0_3] : memref<8x32xf32, #tpu.memory_space<vmem>>, vector<8x32xf32>
    %c0_4 = arith.constant 0 : index
    %c0_5 = arith.constant 0 : index
    %5 = vector.load %arg12[%c0_4, %c0_5] : memref<8x32xf32, #tpu.memory_space<vmem>>, vector<8x32xf32>
    %6 = arith.mulf %5, %3 : vector<8x32xf32>
    %c8_i32 = arith.constant 8 : i32
    %7 = arith.muli %arg0, %c8_i32 : i32
    %8 = tpu.assume_multiple %7, 8 : i32
    %9 = arith.index_cast %8 : i32 to index
    %c0_6 = arith.constant 0 : index
    %10 = vector.load %arg13[%9, %c0_6] : memref<64x128xf32, #tpu.memory_space<vmem>>, vector<8x128xf32>
    %c16 = arith.constant 16 : index
    %c0_7 = arith.constant 0 : index
    %11 = vector.load %arg5[%c16, %c0_7] : memref<48x128xf32, #tpu.memory_space<vmem>>, vector<32x128xf32>
    %cst = arith.constant dense<0.000000e+00> : vector<8x128xf32>
    %12 = tpu.matmul %6, %11, %cst {dimension_numbers = #tpu.dot_dimension_numbers<[1], [0], [0], [1], [0, 0, 1, 1], [], []>} : vector<8x32xf32>, vector<32x128xf32>, vector<8x128xf32> -> vector<8x128xf32>
    %13 = arith.addf %10, %12 : vector<8x128xf32>
    %14 = tpu.iota {dimensions = array<i32: 1>} : vector<8x128xi32>
    %c64_i32 = arith.constant 64 : i32
    %15 = vector.broadcast %c64_i32 : i32 to vector<8x128xi32>
    %16 = arith.cmpi sge, %14, %15 : vector<8x128xi32>
    %c96_i32 = arith.constant 96 : i32
    %17 = vector.broadcast %c96_i32 : i32 to vector<8x128xi32>
    %18 = arith.cmpi slt, %14, %17 : vector<8x128xi32>
    %19 = arith.andi %16, %18 : vector<8x128xi1>
    %20 = math.tanh %13 : vector<8x128xf32>
    %21 = arith.negf %13 : vector<8x128xf32>
    %22 = math.exp %21 : vector<8x128xf32>
    %cst_8 = arith.constant 1.000000e+00 : f32
    %23 = vector.broadcast %cst_8 : f32 to vector<8x128xf32>
    %24 = arith.addf %23, %22 : vector<8x128xf32>
    %25 = arith.divf %23, %24 : vector<8x128xf32>
    %26 = arith.select %19, %20, %25 : vector<8x128xi1>, vector<8x128xf32>
    %27 = vector.extract_strided_slice %26 {offsets = [0, 0], sizes = [8, 32], strides = [1, 1]} : vector<8x128xf32> to vector<8x32xf32>
    %28 = vector.extract_strided_slice %26 {offsets = [0, 32], sizes = [8, 32], strides = [1, 1]} : vector<8x128xf32> to vector<8x32xf32>
    %29 = vector.extract_strided_slice %26 {offsets = [0, 64], sizes = [8, 32], strides = [1, 1]} : vector<8x128xf32> to vector<8x32xf32>
    %30 = vector.extract_strided_slice %26 {offsets = [0, 96], sizes = [8, 32], strides = [1, 1]} : vector<8x128xf32> to vector<8x32xf32>
    %31 = arith.mulf %28, %4 : vector<8x32xf32>
    %32 = arith.mulf %27, %29 : vector<8x32xf32>
    %33 = arith.addf %31, %32 : vector<8x32xf32>
    %34 = math.tanh %33 : vector<8x32xf32>
    %35 = arith.mulf %30, %34 : vector<8x32xf32>
    %c0_9 = arith.constant 0 : index
    %c0_10 = arith.constant 0 : index
    %36 = vector.load %arg7[%c0_9, %c0_10] : memref<64x4xf32, #tpu.memory_space<vmem>>, vector<32x4xf32>
    %cst_11 = arith.constant dense<0.000000e+00> : vector<8x4xf32>
    %37 = tpu.matmul %35, %36, %cst_11 {dimension_numbers = #tpu.dot_dimension_numbers<[1], [0], [0], [1], [0, 0, 1, 1], [], []>} : vector<8x32xf32>, vector<32x4xf32>, vector<8x4xf32> -> vector<8x4xf32>
    %c32 = arith.constant 32 : index
    %c0_12 = arith.constant 0 : index
    %38 = vector.load %arg7[%c32, %c0_12] : memref<64x4xf32, #tpu.memory_space<vmem>>, vector<32x4xf32>
    %cst_13 = arith.constant dense<0.000000e+00> : vector<8x4xf32>
    %39 = tpu.matmul %33, %38, %cst_13 {dimension_numbers = #tpu.dot_dimension_numbers<[1], [0], [0], [1], [0, 0, 1, 1], [], []>} : vector<8x32xf32>, vector<32x4xf32>, vector<8x4xf32> -> vector<8x4xf32>
    %40 = arith.addf %37, %39 : vector<8x4xf32>
    %c0_14 = arith.constant 0 : index
    %c0_15 = arith.constant 0 : index
    %41 = vector.load %arg8[%c0_14, %c0_15] : memref<1x4xf32, #tpu.memory_space<vmem>>, vector<1x4xf32>
    %42 = vector.broadcast %41 : vector<1x4xf32> to vector<8x4xf32>
    %43 = arith.addf %40, %42 : vector<8x4xf32>
    %44 = arith.index_cast %arg0 : i32 to index
    %c0_16 = arith.constant 0 : index
    %c0_17 = arith.constant 0 : index
    %45 = vector.load %arg9[%44, %c0_16, %c0_17] : memref<8x8x4xf32, #tpu.memory_space<vmem>>, vector<1x8x4xf32>
    %46 = vector.shape_cast %45 : vector<1x8x4xf32> to vector<8x4xf32>
    %47 = vector.shape_cast %43 : vector<8x4xf32> to vector<1x8x4xf32>
    tpu.vector_store %arg9[%44, %c0_16, %c0_17], %47 {strides = array<i32>} : memref<8x8x4xf32, #tpu.memory_space<vmem>>, vector<1x8x4xf32>,
    %c0_18 = arith.constant 0 : index
    %c0_19 = arith.constant 0 : index
    %48 = vector.load %arg10[%c0_18, %c0_19] : memref<8x32xf32, #tpu.memory_space<vmem>>, vector<8x32xf32>
    tpu.vector_store %arg10[%c0_18, %c0_19], %35 {strides = array<i32>} : memref<8x32xf32, #tpu.memory_space<vmem>>, vector<8x32xf32>,
    %c0_20 = arith.constant 0 : index
    %c0_21 = arith.constant 0 : index
    %49 = vector.load %arg11[%c0_20, %c0_21] : memref<8x32xf32, #tpu.memory_space<vmem>>, vector<8x32xf32>
    tpu.vector_store %arg11[%c0_20, %c0_21], %33 {strides = array<i32>} : memref<8x32xf32, #tpu.memory_space<vmem>>, vector<8x32xf32>,
    return
  }
  func.func @transform_0(%arg0: i32) -> (i32, i32) {
    %c0_i32 = arith.constant 0 : i32
    %c0_i32_0 = arith.constant 0 : i32
    %c0_i32_1 = arith.constant 0 : i32
    return %c0_i32, %c0_i32_0 : i32, i32
  }
  func.func @transform_1(%arg0: i32) -> (i32, i32) {
    %c0_i32 = arith.constant 0 : i32
    %c0_i32_0 = arith.constant 0 : i32
    %c0_i32_1 = arith.constant 0 : i32
    return %c0_i32, %c0_i32_0 : i32, i32
  }
  func.func @transform_2(%arg0: i32) -> (i32, i32, i32) {
    %c0_i32 = arith.constant 0 : i32
    %c0_i32_0 = arith.constant 0 : i32
    %c0_i32_1 = arith.constant 0 : i32
    %c0_i32_2 = arith.constant 0 : i32
    return %c0_i32, %c0_i32_0, %c0_i32_1 : i32, i32, i32
  }
  func.func @transform_3(%arg0: i32) -> (i32, i32) {
    %c0_i32 = arith.constant 0 : i32
    %c0_i32_0 = arith.constant 0 : i32
    %c0_i32_1 = arith.constant 0 : i32
    return %c0_i32, %c0_i32_0 : i32, i32
  }
  func.func @transform_4(%arg0: i32) -> (i32, i32) {
    %c0_i32 = arith.constant 0 : i32
    %c0_i32_0 = arith.constant 0 : i32
    %c0_i32_1 = arith.constant 0 : i32
    return %c0_i32, %c0_i32_0 : i32, i32
  }
  func.func @transform_5(%arg0: i32) -> (i32, i32) {
    %c0_i32 = arith.constant 0 : i32
    %c0_i32_0 = arith.constant 0 : i32
    %c0_i32_1 = arith.constant 0 : i32
    return %c0_i32, %c0_i32_0 : i32, i32
  }
  func.func @transform_6(%arg0: i32) -> (i32, i32) {
    %c0_i32 = arith.constant 0 : i32
    %c0_i32_0 = arith.constant 0 : i32
    %c0_i32_1 = arith.constant 0 : i32
    return %c0_i32, %c0_i32_0 : i32, i32
  }
  func.func @transform_7(%arg0: i32) -> (i32, i32) {
    %c0_i32 = arith.constant 0 : i32
    %c0_i32_0 = arith.constant 0 : i32
    %c0_i32_1 = arith.constant 0 : i32
    return %c0_i32, %c0_i32_0 : i32, i32
  }
  func.func @transform_8(%arg0: i32) -> (i32, i32, i32) {
    %c0_i32 = arith.constant 0 : i32
    %c0_i32_0 = arith.constant 0 : i32
    %c0_i32_1 = arith.constant 0 : i32
    %c0_i32_2 = arith.constant 0 : i32
    return %c0_i32, %c0_i32_0, %c0_i32_1 : i32, i32, i32
  }
  func.func @transform_9(%arg0: i32) -> (i32, i32) {
    %c0_i32 = arith.constant 0 : i32
    %c0_i32_0 = arith.constant 0 : i32
    %c0_i32_1 = arith.constant 0 : i32
    return %c0_i32, %c0_i32_0 : i32, i32
  }
  func.func @transform_10(%arg0: i32) -> (i32, i32) {
    %c0_i32 = arith.constant 0 : i32
    %c0_i32_0 = arith.constant 0 : i32
    %c0_i32_1 = arith.constant 0 : i32
    return %c0_i32, %c0_i32_0 : i32, i32
  }
}

</mosaic_0001>

<bundles_post_ra>
// kernel: tpu_custom_call.1
= control target key start
LH: loop header
LB: loop body
LE: loop exit
PB: predicated region body
PF: predicated region fallthrough
CT: control target
= control target key end

     0   :  { %16 = vsyncpa [#allocation5], 0  ;;  %s1008_s0 = inlined_call_operand.vmem [shape: f32[64,16], index: 0, kind: input, shape index: {}]   ;;  %s1009_s1 = inlined_call_operand.vmem [shape: f32[8,1], index: 1, kind: input, shape index: {}]   ;;  %s1010_s2 = inlined_call_operand.vmem [shape: f32[2,8,32], index: 2, kind: input, shape index: {}]   ;;  %s1011_s3 = inlined_call_operand.vmem [shape: f32[2,32], index: 3, kind: input, shape index: {}]   ;;  %s1012_s4 = inlined_call_operand.vmem [shape: f32[48,128], index: 4, kind: input, shape index: {}]   ;;  %s1013_s5 = inlined_call_operand.vmem [shape: f32[1,128], index: 5, kind: input, shape index: {}]   ;;  %s1014_s6 = inlined_call_operand.vmem [shape: f32[64,4], index: 6, kind: input, shape index: {}]   ;;  %s1015_s7 = inlined_call_operand.vmem [shape: f32[1,4], index: 7, kind: input, shape index: {}]   ;;  %s1016_s8 = inlined_call_operand.vmem [shape: f32[8,8,4], index: 8, kind: output, shape index: {0}]   ;;  %s1017_s9 = inlined_call_operand.hbm [shape: f32[8,32], index: 9, kind: output, shape index: {1}]   ;;  %s1018_s10 = inlined_call_operand.hbm [shape: f32[8,32], index: 10, kind: output, shape index: {2}]  }
   0x1   :  { %17 = vsyncpa [#allocation7], 0  ;;  %s864_s13 = smov 0  }
   0x2 LB: > { %s870_s14 = sadd.s32 4294967295, %s801_s13   ;;  %p662_p0 = scmp.ge.s32.totalorder %s801_s13, 1  ;;  %s801_s13 = sphi %s864_s13, %s23_s13  }
   0x3   : > { %p294_p1 = scmp.lt.s32.totalorder %s801_s13, 9 }
   0x5   : > { %p295_p2 = pnand %p662_p0, %p294_p1 }
   0x6   : > { %p663_p3 = scmp.ne.s32.totalorder (!%p295_p2), %s870_s14, 0 }
   0x7   : > { %298 = sbr.rel (%p295_p2) target bundleno = 922 (0x39a), region = 52 }
   0xc   : > { %325 = sbr.rel (%p663_p3) target bundleno = 165 (0xa5), region = 56 }
  0x11   : > { %v358_v0 = vld [vmem:[%s1012_s4 + $0x8] sm:$0xff]  ;;  %v357_v1 = vld [vmem:[%s1012_s4] sm:$0xff]  ;;  %vm363_vm0 = vcmask 130048   ;;  %v355_v3 = vld [vmem:[%s1008_s0 + $0x30] sm:$0xff]  ;;  %v803_v7 = vmov 0   ;;  %vm327_vm1 = vcmask 261120  }
  0x12   : > { %685 = vmatpush.msra.mxu2 %v358_v0  ;;  %686 = vmatpush.msra.mxu3 %v358_v0  ;;  %v353_v2 = vld [vmem:[%s1008_s0 + $0x20] sm:$0xff]  ;;  %v351_v5 = vld [vmem:[%s1008_s0 + $0x10] sm:$0xff]  ;;  %v354_v8 = vld [vmem:[%s1008_s0 + $0x28] sm:$0xff] }
  0x13   : > { %402 = vmatpush.msra.mxu0 %v358_v0  ;;  %684 = vmatpush.msra.mxu1 %v358_v0  ;;  %v349_v4 = vld [vmem:[%s1008_s0] sm:$0xff]  ;;  %v356_v9 = vld [vmem:[%s1008_s0 + $0x38] sm:$0xff]  ;;  %v350_v10 = vld [vmem:[%s1008_s0 + $0x8] sm:$0xff] }
  0x14   : > { %688 = vmatpush.msra.mxu2 %v357_v1  ;;  %689 = vmatpush.msra.mxu3 %v357_v1  ;;  %v332_v6 = vld [vmem:[%s1009_s1] sm:$0xff]  ;;  %v352_v11 = vld [vmem:[%s1008_s0 + $0x18] sm:$0xff]  ;;  %v664_v13 = vld [vmem:[%s1010_s2 + $0x8] sm:$0xff] }
  0x15   : > { %669 = vmatmul.msk.f32.vlgmr.msra.gmra.mxu2 %vm363_vm0, %v353_v2  ;;  %671 = vmatmul.msk.f32.vlgmr.msra.gmra.mxu3 %vm363_vm0, %v355_v3  ;;  %v326_v12 = vld [vmem:[%s1010_s2] sm:$0xff]  ;;  %331 = vst.msk [vmem:[#allocation6] sm:$0xff] %vm327_vm1, %v664_v13 }
  0x16   : > { %403 = vmatpush.msra.mxu0 %v357_v1  ;;  %687 = vmatpush.msra.mxu1 %v357_v1  ;;  %328 = vst.msk [vmem:[#allocation4] sm:$0xff] %vm327_vm1, %v326_v12  ;;  %v717_v14 = vld [vmem:[%s1011_s3] ss:$0 sm:$0xff]  ;;  %v718_v15 = vld [vmem:[%s1011_s3 + $0x1] ss:$0 sm:$0xff] }
  0x17   : > { %665 = vmatmul.msk.f32.vlgmr.msra.gmra.mxu0 %vm363_vm0, %v349_v4  ;;  %667 = vmatmul.msk.f32.vlgmr.msra.gmra.mxu1 %vm363_vm0, %v351_v5  ;;  %v719_v20 = vld [vmem:[%s1013_s5] ss:$0 sm:$0xff] }
  0x18   : > { %716 = vset.pattern.permute.xlu0 %v803_v7 }
  0x19   : > { %336 = vperm.xlu0 %716, %v332_v6  }
  0x1d   : > { %670 = vmatmul.msk.f32.gmra.mxu2 %vm363_vm0, %v354_v8  ;;  %672 = vmatmul.msk.f32.gmra.mxu3 %vm363_vm0, %v356_v9 }
  0x1f   : > { %666 = vmatmul.msk.f32.gmra.mxu0 %vm363_vm0, %v350_v10  ;;  %668 = vmatmul.msk.f32.gmra.mxu1 %vm363_vm0, %v352_v11 }
  0x8b   : > { %v337_v16 = vpop.permute.xlu0 %336 }
  0x8c   : > { %v340_v17 = vmul.f32 %v717_v14, %v337_v16 }
  0x8e   : > { %v343_v18 = vadd.f32 %v718_v15, %v340_v17 }
  0x90   : > { %v344_v19 = vmax.f32 %v343_v18, 0.0 }
  0x92   : > { %v345_v21 = vsub.f32 0.0, %v344_v19 }
  0x94   : > { %v346_v22 = vmul.f32 1.442695, %v345_v21  ;;  %v405_v23 = vpop.f32.mrf.mxu0  ;;  %v411_v24 = vpop.f32.mrf.mxu1 }
  0x95   : > { %v406_v25 = vadd.f32 %v719_v20, %v405_v23  ;;  %v412_v26 = vadd.f32 %v719_v20, %v411_v24 }
  0x96   : > { %720 = vpow2.f32 %v346_v22 }
  0x97   : > { %429 = vst [vmem:[#allocation3] sm:$0xff] %v406_v25 }
  0x98   : > { %431 = vst [vmem:[#allocation3 + $0x10] sm:$0xff] %v412_v26  ;;  %v417_v27 = vpop.f32.mrf.mxu2  ;;  %v423_v28 = vpop.f32.mrf.mxu3 }
  0x99   : > { %v418_v29 = vadd.f32 %v719_v20, %v417_v27  ;;  %v424_v30 = vadd.f32 %v719_v20, %v423_v28 }
  0x9b   : > { %433 = vst [vmem:[#allocation3 + $0x20] sm:$0xff] %v418_v29 }
  0x9c   : > { %v721_v31 = vpop.eup %720  ;;  %435 = vst [vmem:[#allocation3 + $0x30] sm:$0xff] %v424_v30  ;;  %v408_v32 = vpop.f32.mrf.mxu0 }
  0x9d   : > { %v414_v33 = vpop.f32.mrf.mxu1  ;;  %348 = vst.msk [vmem:[#allocation2] sm:$0xff] %vm327_vm1, %v721_v31  ;;  %v409_v34 = vadd.f32 %v719_v20, %v408_v32 }
  0x9e   : > { %v415_v35 = vadd.f32 %v719_v20, %v414_v33 }
  0x9f   : > { %430 = vst [vmem:[#allocation3 + $0x8] sm:$0xff] %v409_v34 }
  0xa0   : > { %432 = vst [vmem:[#allocation3 + $0x18] sm:$0xff] %v415_v35  ;;  %v420_v36 = vpop.f32.mrf.mxu2  ;;  %v426_v37 = vpop.f32.mrf.mxu3 }
  0xa1   : > { %v421_v38 = vadd.f32 %v719_v20, %v420_v36  ;;  %v427_v39 = vadd.f32 %v719_v20, %v426_v37 }
  0xa3   : > { %434 = vst [vmem:[#allocation3 + $0x28] sm:$0xff] %v421_v38 }
  0xa4   : > { %436 = vst [vmem:[#allocation3 + $0x38] sm:$0xff] %v427_v39 }
  0xa5 PF: > { %v447_v40 = vld [vmem:[%s1012_s4 + $0x28] sm:$0xff]  ;;  %v446_v41 = vld [vmem:[%s1012_s4 + $0x20] sm:$0xff]  ;;  %v445_v44 = vld [vmem:[%s1012_s4 + $0x18] sm:$0xff]  ;;  %vm448_vm2 = vcmask 261120   ;;  %s673_s19 = sshll.u32 %s870_s14, 3  ;;  %v473_v53 = vlaneseq  ;;  %s804_s21 = smov 64  }
  0xa6   : > { %464 = vmatpush.msra.mxu0 %v447_v40  ;;  %v437_v42 = vld [vmem:[#allocation4] sm:$0xff]  ;;  %v439_v43 = vld [vmem:[#allocation2] sm:$0xff]  ;;  %v444_v45 = vld [vmem:[%s1012_s4 + $0x10] sm:$0xff]  ;;  %s442_s20 = scalar_lea.vmem [#allocation3], %s673_s19  ;;  %s805_s22 = smov 32   ;;  %vm584_vm10 = vcmask 31744  }
  0xa7   : > { %v440_v46 = vmul.f32 %v439_v43, %v437_v42  ;;  %v474_v55 = vand.u32 127, %v473_v53  ;;  %v438_v3 = vld [vmem:[#allocation6] sm:$0xff]  ;;  %v523_v11 = vld [vmem:[%s1014_s6 + $0x18] sm:$0xff]  ;;  %v521_v13 = vld [vmem:[%s1014_s6 + $0x8] sm:$0xff]  ;;  %s806_s11 = smov 96   ;;  %p698_p4 = scmp.eq.s32.totalorder %s870_s14, 7 }
  0xa8   : > { %465 = vmatpush.msra.mxu0 %v446_v41  ;;  %v522_v12 = vld [vmem:[%s1014_s6 + $0x10] sm:$0xff]  ;;  %570 = vmatpush.msra.mxu2 %v523_v11  ;;  %v520_v14 = vld [vmem:[%s1014_s6] sm:$0xff]  ;;  %v527_v17 = vld [vmem:[%s1014_s6 + $0x38] sm:$0xff]  ;;  %s601_s27 = sshll.u32 %s1017_s9, 4  ;;  %s808_s28 = smov [#allocation6]   ;;  %s602_s27 = int_to_ptr.hbm [resolvable:$true] %s601_s27 }
  0xa9   : > { %vm475_vm3 = vcmp.ge.s32.totalorder %v474_v55, 64  ;;  %vm476_vm4 = vcmp.lt.s32.totalorder %v474_v55, 96  ;;  %v526_v18 = vld [vmem:[%s1014_s6 + $0x30] sm:$0xff]  ;;  %545 = vmatpush.msra.mxu1 %v527_v17  ;;  %v525_v19 = vld [vmem:[%s1014_s6 + $0x28] sm:$0xff]  ;;  %v524_v20 = vld [vmem:[%s1014_s6 + $0x20] sm:$0xff]  ;;  %s611_s29 = sshll.u32 %s808_s28, 4  ;;  %s612_s29 = int_to_ptr.vmem [resolvable:$true] %s611_s29 }
  0xaa   : > { %466 = vmatpush.msra.mxu0 %v445_v44  ;;  %vm477_vm6 = vmand %vm475_vm3, %vm476_vm4  ;;  %571 = vmatpush.msra.mxu2 %v522_v12  ;;  %s613_s12 = sshll.u32 %s1018_s10, 4  ;;  %v722_v23 = vld [vmem:[%s1015_s7] ss:$0 sm:$0xff]  ;;  %s614_s12 = int_to_ptr.hbm [resolvable:$true] %s613_s12 }
  0xab   : > { %v443_v47 = vld [vmem:[%s442_s20] sm:$0xff]  ;;  %546 = vmatpush.msra.mxu1 %v526_v18  ;;  %s583_s20 = scalar_lea.vmem %s1016_s8, %s673_s19 }
  0xac   : > { %467 = vmatpush.msra.mxu0 %v444_v45  ;;  %572 = vmatpush.msra.mxu2 %v521_v13 }
  0xad   : > { %674 = vmatmul.msk.f32.vlgmr.msra.gmra.mxu0 %vm448_vm2, %v440_v46  ;;  %547 = vmatpush.msra.mxu1 %v525_v19 }
  0xae   : > { %573 = vmatpush.msra.mxu2 %v520_v14 }
  0xaf   : > { %548 = vmatpush.msra.mxu1 %v524_v20 }
 0x12a   : > { %v469_v48 = vpop.f32.mrf.mxu0 }
 0x12b   : > { %v472_v49 = vadd.f32 %v469_v48, %v443_v47 }
 0x12d   : > { %v675_v50 = vmul.f32 -1.442695, %v472_v49 }
 0x12f   : > { %723 = vpow2.f32 %v675_v50 }
 0x135   : > { %v724_v51 = vpop.eup %723 }
 0x136   : > { %v482_v52 = vadd.f32 1.0, %v724_v51 }
 0x138   : > { %725 = vrcp.f32 %v482_v52  ;;  %v494_v58 = vand.u32 2147483648, %v482_v52  ;;  %v492_v60 = vand.u32 2147483647, %v482_v52  ;;  %vm488_vm7 = vweird.f32 %v482_v52 }
 0x139   : > { %727 = vtanh.f32 %v472_v49 }
 0x13a   : > { %v495_v62 = vor.u32 1.1754944e-38, %v494_v58  ;;  %vm493_vm9 = vcmp.eq.f32.partialorder %v492_v60, 8.507059e+37 }
 0x13e   : > { %v726_v54 = vpop.eup %725 }
 0x13f   : > { %v484_v56 = vmul.f32 %v726_v54, %v482_v52  ;;  %vm489_vm5 = vweird.f32 %v726_v54  ;;  %v728_v0 = vpop.eup %727 }
 0x140   : > { %vm490_vm8 = vmor %vm488_vm7, %vm489_vm5 }
 0x141   : > { %v485_v57 = vsub.f32 1.0, %v484_v56 }
 0x143   : > { %v486_v59 = vmul.f32 %v726_v54, %v485_v57 }
 0x145   : > { %v487_v61 = vadd.f32 %v726_v54, %v486_v59 }
 0x147   : > { %v491_v63 = vsel %vm490_vm8, %v726_v54, %v487_v61 }
 0x148   : > { %v496_v1 = vsel %vm493_vm9, %v495_v62, %v491_v63 }
 0x149   : > { %v498_v2 = vsel %vm477_vm6, %v728_v0, %v496_v1 }
 0x14a   : > { %505 = vrot.lane.b32.xlu0 %v498_v2, %s804_s21 }
 0x152   : > { %500 = vrot.lane.b32.xlu0 %v438_v3, %s805_s22 }
 0x1bc   : > { %v506_v4 = vpop.permute.xlu0 %505 }
 0x1bd   : > { %v508_v5 = vmul.f32 %v506_v4, %v498_v2 }
 0x1bf   : > { %510 = vrot.lane.b32.xlu1 %v508_v5, %s805_s22 }
 0x1c4   : > { %v501_v6 = vpop.permute.xlu0 %500 }
 0x1c5   : > { %v503_v7 = vmul.f32 %v501_v6, %v498_v2 }
 0x231   : > { %v511_v8 = vpop.permute.xlu1 %510 }
 0x232   : > { %v513_v9 = vadd.f32 %v511_v8, %v503_v7 }
 0x234   : > { %729 = vtanh.f32 %v513_v9 }
 0x23a   : > { %v730_v10 = vpop.eup %729 }
 0x23b   : > { %516 = vrot.lane.b32.xlu1 %v730_v10, %s804_s21 }
 0x2ad   : > { %v517_v15 = vpop.permute.xlu1 %516 }
 0x2ae   : > { %v519_v16 = vmul.f32 %v517_v15, %v498_v2 }
 0x2b0   : > { %554 = vrot.lane.b32.xlu2 %v519_v16, %s805_s22  ;;  %s807_s22 = smov [#allocation4]  }
 0x2b1   : > { %s599_s24 = sshll.u32 %s807_s22, 4  ;;  %s600_s24 = int_to_ptr.vmem [resolvable:$true] %s599_s24 }
 0x2b8   : > { %529 = vrot.lane.b32.xlu2 %v513_v9, %s806_s11 }
 0x30a   : > { %v555_v21 = vpop.permute.xlu2 %554 }
 0x30b   : > { %587 = vst.msk [vmem:[#allocation4] sm:$0xff] %vm448_vm2, %v555_v21  ;;  %677 = vmatmul.msk.f32.vlgmr.msra.gmra.mxu2 %vm448_vm2, %v555_v21 }
 0x30c   : > { %691 = dma.vmem_to_hbm [thread:$0]  (%p698_p4), %s600_s24, 128, %s602_s27, [#allocation5]  }
 0x312   : > { %v530_v22 = vpop.permute.xlu2 %529 }
 0x313   : > { %589 = vst.msk [vmem:[#allocation6] sm:$0xff] %vm448_vm2, %v530_v22  ;;  %676 = vmatmul.msk.f32.vlgmr.msra.gmra.mxu1 %vm448_vm2, %v530_v22 }
 0x314   : > { %693 = dma.vmem_to_hbm [thread:$0]  (%p698_p4), %s612_s29, 128, %s614_s12, [#allocation7]  }
 0x38e   : > { %v575_v24 = vpop.f32.mrf.mxu2 }
 0x390   : > { %v550_v25 = vpop.f32.mrf.mxu1 }
 0x391   : > { %v576_v26 = vadd.f32 %v575_v24, %v550_v25 }
 0x393   : > { %v582_v27 = vadd.f32 %v722_v23, %v576_v26 }
 0x395   : > { %585 = vst.msk [vmem:[%s583_s20] sm:$0xff] %vm584_vm10, %v582_v27 }
 0x396   : > { %792 = dma.done.wait (%p698_p4), [#allocation5], 128  }
 0x397   : > { %794 = vsyncadd (%p698_p4), [#allocation5], 4294967168 }
 0x398   : > { %796 = dma.done.wait (%p698_p4), [#allocation7], 128  }
 0x399   : > { %798 = vsyncadd (%p698_p4), [#allocation7], 4294967168 }
 0x39a PF: > { %s23_s13 = sadd.s32 1, %s801_s13  }
 0x39b   : > { %p20_p5 = scmp.ge.s32.totalorder %s23_s13, 10  }
 0x39d   :  { %22 = sbr.rel (!%p20_p5) target bundleno = 2 (0x2), region = 99 }
 0x3a2   :  { %635 = vsyncpa [#allocation5], 1 }
 0x3a3   :  { %637 = vsyncpa [#allocation5 + $0x1], 1 }
 0x3a4   :  { %638 = vsyncpa [#allocation7], 1 }

</bundles_post_ra>
